<compile_context>
chip_gen: v7x
topology: tpu7x:2x2x1
jax: 0.10.0
libtpu: 0.0.40
codegen_flags: <defaults>
</compile_context>

<pallas_src>
import jax
import jax.numpy as jnp
from jax.experimental import pallas as pl
from jax.experimental.pallas import tpu as pltpu


# ----------------------------- Pallas kernel ------------------------------- #

def _cnn2d_fused_kernel(x_ref, wc_ref, bc_ref, wf_ref, bf_ref, o_ref):
    """One batch element: im2col-conv + bias + ReLU + channel-major FC.

    x_ref : (1, K, P)      im2col patches (K = C_in*k*k, P = H_out*W_out)
    wc_ref: (C_out, K)     conv weight (reshaped)
    bc_ref: (C_out, 1)     conv bias as a column
    wf_ref: (C_out, P, J)  FC weight, pre-permuted to match the (c, p) layout
    bf_ref: (1, J)         FC bias as a row
    o_ref : (1, 1, J)      logits for this batch element
    """
    x = x_ref[0]                                                   # (K, P)

    # conv0 + relu0: channel-major conv output, held in registers only.
    conv = jnp.dot(wc_ref[...], x, preferred_element_type=jnp.float32)
    conv = jnp.maximum(conv + bc_ref[...], 0.0)                    # (C_out, P) f32

    # flat0 + dense_out: PyTorch's channel-major flatten is folded into wf's
    # layout, so the FC is a sum over channels of (1,P)@(P,J) MXU matmuls.
    acc = bf_ref[...]                                              # (1, J)
    for c in range(conv.shape[0]):                                 # static unroll, C_out=8
        acc = acc + jnp.dot(conv[c:c + 1, :], wf_ref[c],
                            preferred_element_type=jnp.float32)

    o_ref[0] = acc.astype(o_ref.dtype)


# ------------------------------- glue (JAX) -------------------------------- #

def im2col_kp(x, k, stride):
    """x: (N, C, H, W) -> patches (N, K, P); K ordered (c, kh, kw), P = Ho*Wo."""
    N, C, H, W = x.shape
    Ho = (H - k) // stride + 1
    Wo = (W - k) // stride + 1
    cols = []
    for kh in range(k):
        for kw in range(k):
            cols.append(x[:, :, kh:kh + stride * Ho:stride, kw:kw + stride * Wo:stride])
    patches = jnp.stack(cols, axis=2)                  # (N, C, k*k, Ho, Wo)
    patches = patches.reshape(N, C * k * k, Ho * Wo)   # (N, K, P)
    return patches, Ho, Wo


def init_params(key, in_channels=1, n_channels=8, kernel=3, n_classes=8, fc_in=840):
    """Deterministic synthetic init (PyTorch-style uniform bounds)."""
    k1, k2, k3, k4 = jax.random.split(key, 4)
    fan_conv = in_channels * kernel * kernel
    bc = 1.0 / float(fan_conv) ** 0.5
    bf = 1.0 / float(fc_in) ** 0.5
    return {
        "w_conv": jax.random.uniform(k1, (n_channels, in_channels, kernel, kernel),
                                     jnp.float32, -bc, bc),
        "b_conv": jax.random.uniform(k2, (n_channels,), jnp.float32, -bc, bc),
        "w_fc": jax.random.uniform(k3, (n_classes, fc_in), jnp.float32, -bf, bf),
        "b_fc": jax.random.uniform(k4, (n_classes,), jnp.float32, -bf, bf),
    }


def prepare_kernel_params(params, p_spatial):
    """One-time, static re-layout of the weights for the fused kernel."""
    C_out, C_in, k, _ = params["w_conv"].shape
    J = params["w_fc"].shape[0]
    P = p_spatial
    return {
        "w_conv2": params["w_conv"].reshape(C_out, C_in * k * k),            # (C_out, K)
        "b_conv_col": params["b_conv"].reshape(C_out, 1),                    # (C_out, 1)
        # w_fc[j, c*P + p] -> w_fc_perm[c, p, j]  (absorbs channel-major Flatten)
        "w_fc_perm": params["w_fc"].reshape(J, C_out, P).transpose(1, 2, 0),  # (C_out, P, J)
        "b_fc_row": params["b_fc"].reshape(1, J),                            # (1, J)
    }


def cnn2d_forward(prep, x, kernel=3, stride=1):
    patches, Ho, Wo = im2col_kp(x, kernel, stride)
    patches = patches.astype(jnp.float32)                 # (N, K, P)
    N, K, P = patches.shape
    C_out = prep["w_conv2"].shape[0]
    J = prep["w_fc_perm"].shape[2]

    flops = int(N * (2 * C_out * K * P + 2 * C_out * P * J))
    bytes_accessed = int(4 * (patches.size + prep["w_conv2"].size
                              + prep["b_conv_col"].size + prep["w_fc_perm"].size
                              + prep["b_fc_row"].size + N * J))

    out = pl.pallas_call(
        _cnn2d_fused_kernel,
        out_shape=jax.ShapeDtypeStruct((N, 1, J), jnp.float32),
        grid=(N,),
        in_specs=[
            pl.BlockSpec((1, K, P), lambda n: (n, 0, 0)),       # patches: per-sample block
            pl.BlockSpec((C_out, K), lambda n: (0, 0)),         # conv weight (constant)
            pl.BlockSpec((C_out, 1), lambda n: (0, 0)),         # conv bias (constant)
            pl.BlockSpec((C_out, P, J), lambda n: (0, 0, 0)),   # permuted FC weight (constant)
            pl.BlockSpec((1, J), lambda n: (0, 0)),             # FC bias (constant)
        ],
        out_specs=pl.BlockSpec((1, 1, J), lambda n: (n, 0, 0)),
        compiler_params=pltpu.CompilerParams(dimension_semantics=("parallel",)),
        cost_estimate=pl.CostEstimate(flops=flops, transcendentals=0,
                                      bytes_accessed=bytes_accessed),
    )(patches, prep["w_conv2"], prep["b_conv_col"], prep["w_fc_perm"], prep["b_fc_row"])
    return out.reshape(N, J)


def ref_forward(params, x, kernel=3, stride=1):
    out = jax.lax.conv_general_dilated(
        x, params["w_conv"], (stride, stride), "VALID",
        dimension_numbers=("NCHW", "OIHW", "NCHW"))
    out = jnp.maximum(out + params["b_conv"][None, :, None, None], 0.0)
    out = out.reshape(out.shape[0], -1)
    return out @ params["w_fc"].T + params["b_fc"]


if __name__ == "__main__":
    # Input spatial size chosen so Flatten yields 840 features:
    # (9-2) * (17-2) * 8 channels = 7 * 15 * 8 = 840, matching nn.Linear(840, 8).
    key = jax.random.PRNGKey(0)
    kx, kp = jax.random.split(key)
    x = jax.random.normal(kx, (2, 1, 9, 17), jnp.float32)
    params = init_params(kp)
    prep = prepare_kernel_params(params, p_spatial=7 * 15)   # one-time weight re-layout

    fwd = jax.jit(cnn2d_forward)
    out = jax.block_until_ready(fwd(prep, x))
    ref = ref_forward(params, x)

    assert out.shape == (2, 8), out.shape
    assert jnp.allclose(out, ref, atol=1e-4, rtol=1e-4), "mismatch vs JAX reference"
    print("KERNEL_OK")
</pallas_src>

<mosaic_0001>
module attributes {stable_mosaic.version = 11 : i64} {
  func.func @_cnn2d_fused_kernel(%arg0: i32, %arg1: memref<1x9x105xf32, #tpu.memory_space<vmem>>, %arg2: memref<8x9xf32, #tpu.memory_space<vmem>>, %arg3: memref<8x1xf32, #tpu.memory_space<vmem>>, %arg4: memref<8x105x8xf32, #tpu.memory_space<vmem>>, %arg5: memref<1x8xf32, #tpu.memory_space<vmem>>, %arg6: memref<1x1x8xf32, #tpu.memory_space<vmem>>) attributes {dimension_semantics = [#tpu.dimension_semantics<parallel>], iteration_bounds = array<i64: 2>, scalar_prefetch = 0 : i64, scratch_operands = 0 : i64, tpu.core_type = #tpu.core_type<tc>, window_params = [{transform_indices = @transform_0, window_bounds = array<i64: 1, 9, 105>}, {pipeline_mode = #tpu.pipeline_mode<synchronous>, transform_indices = @transform_1, window_bounds = array<i64: 8, 9>}, {pipeline_mode = #tpu.pipeline_mode<synchronous>, transform_indices = @transform_2, window_bounds = array<i64: 8, 1>}, {pipeline_mode = #tpu.pipeline_mode<synchronous>, transform_indices = @transform_3, window_bounds = array<i64: 8, 105, 8>}, {pipeline_mode = #tpu.pipeline_mode<synchronous>, transform_indices = @transform_4, window_bounds = array<i64: 1, 8>}, {transform_indices = @transform_5, window_bounds = array<i64: 1, 1, 8>}]} {
    %c0 = arith.constant 0 : index
    %c0_0 = arith.constant 0 : index
    %c0_1 = arith.constant 0 : index
    %0 = vector.load %arg1[%c0, %c0_0, %c0_1] : memref<1x9x105xf32, #tpu.memory_space<vmem>>, vector<1x9x105xf32>
    %1 = vector.shape_cast %0 : vector<1x9x105xf32> to vector<9x105xf32>
    %c0_2 = arith.constant 0 : index
    %c0_3 = arith.constant 0 : index
    %2 = vector.load %arg2[%c0_2, %c0_3] : memref<8x9xf32, #tpu.memory_space<vmem>>, vector<8x9xf32>
    %cst = arith.constant dense<0.000000e+00> : vector<8x105xf32>
    %3 = tpu.matmul %2, %1, %cst {dimension_numbers = #tpu.dot_dimension_numbers<[1], [0], [0], [1], [0, 0, 1, 1], [], []>} : vector<8x9xf32>, vector<9x105xf32>, vector<8x105xf32> -> vector<8x105xf32>
    %c0_4 = arith.constant 0 : index
    %c0_5 = arith.constant 0 : index
    %4 = vector.load %arg3[%c0_4, %c0_5] : memref<8x1xf32, #tpu.memory_space<vmem>>, vector<8x1xf32>
    %5 = vector.broadcast %4 : vector<8x1xf32> to vector<8x105xf32>
    %6 = arith.addf %3, %5 : vector<8x105xf32>
    %cst_6 = arith.constant 0.000000e+00 : f32
    %7 = vector.broadcast %cst_6 : f32 to vector<8x105xf32>
    %8 = arith.maximumf %6, %7 : vector<8x105xf32>
    %c0_7 = arith.constant 0 : index
    %c0_8 = arith.constant 0 : index
    %9 = vector.load %arg5[%c0_7, %c0_8] : memref<1x8xf32, #tpu.memory_space<vmem>>, vector<1x8xf32>
    %10 = vector.extract_strided_slice %8 {offsets = [0, 0], sizes = [1, 105], strides = [1, 1]} : vector<8x105xf32> to vector<1x105xf32>
    %c0_9 = arith.constant 0 : index
    %c0_10 = arith.constant 0 : index
    %c0_11 = arith.constant 0 : index
    %11 = vector.load %arg4[%c0_9, %c0_10, %c0_11] : memref<8x105x8xf32, #tpu.memory_space<vmem>>, vector<1x105x8xf32>
    %12 = vector.shape_cast %11 : vector<1x105x8xf32> to vector<105x8xf32>
    %cst_12 = arith.constant dense<0.000000e+00> : vector<1x8xf32>
    %13 = tpu.matmul %10, %12, %cst_12 {dimension_numbers = #tpu.dot_dimension_numbers<[1], [0], [0], [1], [0, 0, 1, 1], [], []>} : vector<1x105xf32>, vector<105x8xf32>, vector<1x8xf32> -> vector<1x8xf32>
    %14 = arith.addf %9, %13 : vector<1x8xf32>
    %15 = vector.extract_strided_slice %8 {offsets = [1, 0], sizes = [1, 105], strides = [1, 1]} : vector<8x105xf32> to vector<1x105xf32>
    %c1 = arith.constant 1 : index
    %c0_13 = arith.constant 0 : index
    %c0_14 = arith.constant 0 : index
    %16 = vector.load %arg4[%c1, %c0_13, %c0_14] : memref<8x105x8xf32, #tpu.memory_space<vmem>>, vector<1x105x8xf32>
    %17 = vector.shape_cast %16 : vector<1x105x8xf32> to vector<105x8xf32>
    %cst_15 = arith.constant dense<0.000000e+00> : vector<1x8xf32>
    %18 = tpu.matmul %15, %17, %cst_15 {dimension_numbers = #tpu.dot_dimension_numbers<[1], [0], [0], [1], [0, 0, 1, 1], [], []>} : vector<1x105xf32>, vector<105x8xf32>, vector<1x8xf32> -> vector<1x8xf32>
    %19 = arith.addf %14, %18 : vector<1x8xf32>
    %20 = vector.extract_strided_slice %8 {offsets = [2, 0], sizes = [1, 105], strides = [1, 1]} : vector<8x105xf32> to vector<1x105xf32>
    %c2 = arith.constant 2 : index
    %c0_16 = arith.constant 0 : index
    %c0_17 = arith.constant 0 : index
    %21 = vector.load %arg4[%c2, %c0_16, %c0_17] : memref<8x105x8xf32, #tpu.memory_space<vmem>>, vector<1x105x8xf32>
    %22 = vector.shape_cast %21 : vector<1x105x8xf32> to vector<105x8xf32>
    %cst_18 = arith.constant dense<0.000000e+00> : vector<1x8xf32>
    %23 = tpu.matmul %20, %22, %cst_18 {dimension_numbers = #tpu.dot_dimension_numbers<[1], [0], [0], [1], [0, 0, 1, 1], [], []>} : vector<1x105xf32>, vector<105x8xf32>, vector<1x8xf32> -> vector<1x8xf32>
    %24 = arith.addf %19, %23 : vector<1x8xf32>
    %25 = vector.extract_strided_slice %8 {offsets = [3, 0], sizes = [1, 105], strides = [1, 1]} : vector<8x105xf32> to vector<1x105xf32>
    %c3 = arith.constant 3 : index
    %c0_19 = arith.constant 0 : index
    %c0_20 = arith.constant 0 : index
    %26 = vector.load %arg4[%c3, %c0_19, %c0_20] : memref<8x105x8xf32, #tpu.memory_space<vmem>>, vector<1x105x8xf32>
    %27 = vector.shape_cast %26 : vector<1x105x8xf32> to vector<105x8xf32>
    %cst_21 = arith.constant dense<0.000000e+00> : vector<1x8xf32>
    %28 = tpu.matmul %25, %27, %cst_21 {dimension_numbers = #tpu.dot_dimension_numbers<[1], [0], [0], [1], [0, 0, 1, 1], [], []>} : vector<1x105xf32>, vector<105x8xf32>, vector<1x8xf32> -> vector<1x8xf32>
    %29 = arith.addf %24, %28 : vector<1x8xf32>
    %30 = vector.extract_strided_slice %8 {offsets = [4, 0], sizes = [1, 105], strides = [1, 1]} : vector<8x105xf32> to vector<1x105xf32>
    %c4 = arith.constant 4 : index
    %c0_22 = arith.constant 0 : index
    %c0_23 = arith.constant 0 : index
    %31 = vector.load %arg4[%c4, %c0_22, %c0_23] : memref<8x105x8xf32, #tpu.memory_space<vmem>>, vector<1x105x8xf32>
    %32 = vector.shape_cast %31 : vector<1x105x8xf32> to vector<105x8xf32>
    %cst_24 = arith.constant dense<0.000000e+00> : vector<1x8xf32>
    %33 = tpu.matmul %30, %32, %cst_24 {dimension_numbers = #tpu.dot_dimension_numbers<[1], [0], [0], [1], [0, 0, 1, 1], [], []>} : vector<1x105xf32>, vector<105x8xf32>, vector<1x8xf32> -> vector<1x8xf32>
    %34 = arith.addf %29, %33 : vector<1x8xf32>
    %35 = vector.extract_strided_slice %8 {offsets = [5, 0], sizes = [1, 105], strides = [1, 1]} : vector<8x105xf32> to vector<1x105xf32>
    %c5 = arith.constant 5 : index
    %c0_25 = arith.constant 0 : index
    %c0_26 = arith.constant 0 : index
    %36 = vector.load %arg4[%c5, %c0_25, %c0_26] : memref<8x105x8xf32, #tpu.memory_space<vmem>>, vector<1x105x8xf32>
    %37 = vector.shape_cast %36 : vector<1x105x8xf32> to vector<105x8xf32>
    %cst_27 = arith.constant dense<0.000000e+00> : vector<1x8xf32>
    %38 = tpu.matmul %35, %37, %cst_27 {dimension_numbers = #tpu.dot_dimension_numbers<[1], [0], [0], [1], [0, 0, 1, 1], [], []>} : vector<1x105xf32>, vector<105x8xf32>, vector<1x8xf32> -> vector<1x8xf32>
    %39 = arith.addf %34, %38 : vector<1x8xf32>
    %40 = vector.extract_strided_slice %8 {offsets = [6, 0], sizes = [1, 105], strides = [1, 1]} : vector<8x105xf32> to vector<1x105xf32>
    %c6 = arith.constant 6 : index
    %c0_28 = arith.constant 0 : index
    %c0_29 = arith.constant 0 : index
    %41 = vector.load %arg4[%c6, %c0_28, %c0_29] : memref<8x105x8xf32, #tpu.memory_space<vmem>>, vector<1x105x8xf32>
    %42 = vector.shape_cast %41 : vector<1x105x8xf32> to vector<105x8xf32>
    %cst_30 = arith.constant dense<0.000000e+00> : vector<1x8xf32>
    %43 = tpu.matmul %40, %42, %cst_30 {dimension_numbers = #tpu.dot_dimension_numbers<[1], [0], [0], [1], [0, 0, 1, 1], [], []>} : vector<1x105xf32>, vector<105x8xf32>, vector<1x8xf32> -> vector<1x8xf32>
    %44 = arith.addf %39, %43 : vector<1x8xf32>
    %45 = vector.extract_strided_slice %8 {offsets = [7, 0], sizes = [1, 105], strides = [1, 1]} : vector<8x105xf32> to vector<1x105xf32>
    %c7 = arith.constant 7 : index
    %c0_31 = arith.constant 0 : index
    %c0_32 = arith.constant 0 : index
    %46 = vector.load %arg4[%c7, %c0_31, %c0_32] : memref<8x105x8xf32, #tpu.memory_space<vmem>>, vector<1x105x8xf32>
    %47 = vector.shape_cast %46 : vector<1x105x8xf32> to vector<105x8xf32>
    %cst_33 = arith.constant dense<0.000000e+00> : vector<1x8xf32>
    %48 = tpu.matmul %45, %47, %cst_33 {dimension_numbers = #tpu.dot_dimension_numbers<[1], [0], [0], [1], [0, 0, 1, 1], [], []>} : vector<1x105xf32>, vector<105x8xf32>, vector<1x8xf32> -> vector<1x8xf32>
    %49 = arith.addf %44, %48 : vector<1x8xf32>
    %c0_34 = arith.constant 0 : index
    %c0_35 = arith.constant 0 : index
    %c0_36 = arith.constant 0 : index
    %50 = vector.load %arg6[%c0_34, %c0_35, %c0_36] : memref<1x1x8xf32, #tpu.memory_space<vmem>>, vector<1x1x8xf32>
    %51 = vector.shape_cast %50 : vector<1x1x8xf32> to vector<1x8xf32>
    %52 = vector.shape_cast %49 : vector<1x8xf32> to vector<1x1x8xf32>
    tpu.vector_store %arg6[%c0_34, %c0_35, %c0_36], %52 {strides = array<i32>} : memref<1x1x8xf32, #tpu.memory_space<vmem>>, vector<1x1x8xf32>,
    return
  }
  func.func @transform_0(%arg0: i32) -> (i32, i32, i32) {
    %c0_i32 = arith.constant 0 : i32
    %c0_i32_0 = arith.constant 0 : i32
    %c0_i32_1 = arith.constant 0 : i32
    return %arg0, %c0_i32, %c0_i32_0 : i32, i32, i32
  }
  func.func @transform_1(%arg0: i32) -> (i32, i32) {
    %c0_i32 = arith.constant 0 : i32
    %c0_i32_0 = arith.constant 0 : i32
    %c0_i32_1 = arith.constant 0 : i32
    return %c0_i32, %c0_i32_0 : i32, i32
  }
  func.func @transform_2(%arg0: i32) -> (i32, i32) {
    %c0_i32 = arith.constant 0 : i32
    %c0_i32_0 = arith.constant 0 : i32
    %c0_i32_1 = arith.constant 0 : i32
    return %c0_i32, %c0_i32_0 : i32, i32
  }
  func.func @transform_3(%arg0: i32) -> (i32, i32, i32) {
    %c0_i32 = arith.constant 0 : i32
    %c0_i32_0 = arith.constant 0 : i32
    %c0_i32_1 = arith.constant 0 : i32
    %c0_i32_2 = arith.constant 0 : i32
    return %c0_i32, %c0_i32_0, %c0_i32_1 : i32, i32, i32
  }
  func.func @transform_4(%arg0: i32) -> (i32, i32) {
    %c0_i32 = arith.constant 0 : i32
    %c0_i32_0 = arith.constant 0 : i32
    %c0_i32_1 = arith.constant 0 : i32
    return %c0_i32, %c0_i32_0 : i32, i32
  }
  func.func @transform_5(%arg0: i32) -> (i32, i32, i32) {
    %c0_i32 = arith.constant 0 : i32
    %c0_i32_0 = arith.constant 0 : i32
    %c0_i32_1 = arith.constant 0 : i32
    return %arg0, %c0_i32, %c0_i32_0 : i32, i32, i32
  }
}

</mosaic_0001>

<bundles_post_ra>
// kernel: cnn2d_forward.1
= control target key start
LH: loop header
LB: loop body
LE: loop exit
PB: predicated region body
PF: predicated region fallthrough
CT: control target
= control target key end

     0   :  { %10 = vsyncpa [#allocation3], 0  ;;  %s2521_s0 = inlined_call_operand.vmem [shape: f32[2,9,105], index: 0, kind: input, shape index: {}]   ;;  %s2522_s1 = inlined_call_operand.vmem [shape: f32[8,9], index: 1, kind: input, shape index: {}]   ;;  %s2523_s2 = inlined_call_operand.vmem [shape: f32[8,1], index: 2, kind: input, shape index: {}]   ;;  %s2524_s3 = inlined_call_operand.vmem [shape: f32[8,105,8], index: 3, kind: input, shape index: {}]   ;;  %s2525_s4 = inlined_call_operand.vmem [shape: f32[1,8], index: 4, kind: input, shape index: {}]   ;;  %s2526_s5 = inlined_call_operand.hbm [shape: f32[2,1,8], index: 5, kind: output, shape index: {}]  }
   0x1   :  { %12 = vsyncpa [#allocation3 + $0x1], 0  ;;  %s1960_s18 = smov 0   ;;  %s1962_s19 = smov 0  }
   0x2   :  { %s1964_s20 = smov 0   ;;  %s1966_s21 = smov 0  }
   0x3 LB: > { %s1981_s22 = sadd.s32 4294967295, %s1922_s21   ;;  %s1117_s23 = sadd.s32 4294967294, %s1922_s21   ;;  %s1922_s21 = sphi %s1966_s21, %s2534_s21   ;;  %s1918_s20 = sphi %s1964_s20, %s2533_s20   ;;  %s1914_s19 = sphi %s1962_s19, %s2532_s19   ;;  %s1910_s18 = sphi %s1960_s18, %s2531_s18  }
   0x4   : > { %s1985_s24 = sadd.s32 1, %s1922_s21   ;;  %s135_s25 = sadd.s32 1, %s1918_s20 }
   0x5   : > { %s132_s26 = ssub.s32 %s1922_s21, %s1985_s24  ;;  %p145_p0 = scmp.ne.s32.totalorder %s1918_s20, %s1914_s19 }
   0x6   : > { %p133_p1 = scmp.eq.s32.totalorder %s132_s26, 0  ;;  %p146_p2 = scmp.eq.s32.totalorder %s1981_s22, 1 }
   0x7   : > { %p151_p3 = scmp.ne.s32.totalorder %s1914_s19, %s1910_s18  ;;  %p152_p4 = scmp.eq.s32.totalorder %s1117_s23, 1 }
   0x8   : > { %s1996_s27 = scalar_select %p133_p1, %s1918_s20, %s135_s25  }
   0x9   : > { %p1998_p5 = por %p146_p2, %p145_p0  ;;  %p2002_p6 = por %p152_p4, %p151_p3 }
   0xa   : > { %p1120_p7 = scmp.ge.s32.totalorder %s1922_s21, 1  ;;  %p190_p8 = scmp.lt.s32.totalorder %s1922_s21, 3 }
   0xc   : > { %p191_p9 = pnand %p1120_p7, %p190_p8 }
   0xd   : > { %p217_p10 = scmp.lt.s32.totalorder (!%p191_p9), %s1981_s22, 1  ;;  %v1924_v0 = vmov (!%p191_p9), 0.0|0.0   ;;  %vm235_vm0 = vcmask (!%p191_p9), 1040384   ;;  %v225_v1 = vld [vmem:[%s2523_s2] sm:$0xff] (!%p191_p9)  ;;  %vm1925_vm1 = vmmov (!%p191_p9), 0   ;;  %v1926_v2 = vmov (!%p191_p9), 0.0  }
   0xe   : > { %194 = sbr.rel (%p191_p9) target bundleno = 561 (0x231), region = 40  ;;  %1621 = vmatprep.subr.bf16.mxu0 (!%p191_p9), %v1924_v0  ;;  %1713 = vmatprep.subr.bf16.mxu1 (!%p191_p9), %v1924_v0  ;;  %v1927_v3 = vmov (!%p191_p9), 0   ;;  %v1175_v4 = vld [vmem:[%s2524_s3 + $0x1c0] sm:$0xff] (!%p191_p9)  ;;  %v1176_v5 = vld [vmem:[%s2524_s3 + $0x1c8] sm:$0xff] (!%p191_p9)  ;;  %v1177_v7 = vld [vmem:[%s2524_s3 + $0x1d0] sm:$0xff] (!%p191_p9)  ;;  %vm1928_vm2 = vmmov (!%p191_p9), 1  }
   0xf   : > { %1370 = vmatprep.mubr.msk.f32.mxu0 (!%p191_p9), %vm1925_vm1, %v1926_v2  ;;  %1859 = vset.pattern.permute.xlu0 (!%p191_p9), %v1927_v3  ;;  %v1714_v6 = vpack.c.bf16 (!%p191_p9), %v1176_v5, %v1175_v4  ;;  %vm2029_vm3 = vmpackc.low (!%p191_p9), %vm235_vm0, %vm1928_vm2  ;;  %v1178_v9 = vld [vmem:[%s2524_s3 + $0x1d8] sm:$0xff] (!%p191_p9)  ;;  %v311_v10 = vld [vmem:[%s2524_s3] sm:$0xff] (!%p191_p9)  ;;  %vm231_vm4 = vcmask (!%p191_p9), 72704   ;;  %vm325_vm5 = vcmask (!%p191_p9), 859136   ;;  %s1239_s17 = sshll.u32 (!%p191_p9), %s1981_s22, 4  ;;  %vm1047_vm6 = vcmask (!%p191_p9), 57344  }
  0x10   : > { %228 = vperm.xlu0 (!%p191_p9), %1859, %v225_v1   ;;  %1525 = vmatprep.mubr.msk.f32.mxu1 (!%p191_p9), %vm1925_vm1, %v1926_v2  ;;  %v312_v11 = vld [vmem:[%s2524_s3 + $0x8] sm:$0xff] (!%p191_p9)  ;;  %v1717_v12 = vpack.c.bf16 (!%p191_p9), %v1178_v9, %v1177_v7  ;;  %v1179_v13 = vld [vmem:[%s2524_s3 + $0x1e0] sm:$0xff] (!%p191_p9)  ;;  %v313_v20 = vld [vmem:[%s2524_s3 + $0x10] sm:$0xff] (!%p191_p9)  ;;  %s2479_s6 = scalar_lea.hbm (!%p191_p9), %s2526_s5, %s1239_s17  ;;  %s1929_s8 = smov (!%p191_p9), [#allocation2]  }
  0x11   : > { %1715 = vmatpush3.bf16.msra.mxu1 (!%p191_p9), %v1714_v6  ;;  %v1180_v16 = vld [vmem:[%s2524_s3 + $0x1e8] sm:$0xff] (!%p191_p9)  ;;  %v224_v18 = vld [vmem:[%s2522_s1] sm:$0xff] (!%p191_p9)  ;;  %v1626_v19 = vpack.c.bf16 (!%p191_p9), %v312_v11, %v311_v10  ;;  %v314_v22 = vld [vmem:[%s2524_s3 + $0x18] sm:$0xff] (!%p191_p9)  ;;  %s1864_s9 = sshll.u32 (!%p191_p9), %s1929_s8, 4  ;;  %s1865_s9 = int_to_ptr.vmem [resolvable:$false] %s1864_s9 }
  0x12   : > { %1716 = vmatprep.subr.bf16.mxu1 (!%p191_p9), %v1924_v0  ;;  %v1720_v21 = vpack.c.bf16 (!%p191_p9), %v1180_v16, %v1179_v13  ;;  %v1181_v23 = vld [vmem:[%s2524_s3 + $0x1f0] sm:$0xff] (!%p191_p9)  ;;  %v1182_v24 = vld [vmem:[%s2524_s3 + $0x1f8] sm:$0xff] (!%p191_p9)  ;;  %v1629_v25 = vpack.c.bf16 (!%p191_p9), %v314_v22, %v313_v20  ;;  %v315_v26 = vld [vmem:[%s2524_s3 + $0x20] sm:$0xff] (!%p191_p9)  ;;  %s1866_s10 = scalar_lea.vmem (!%p191_p9), %s1865_s9, 32 }
  0x13   : > { %v1723_v27 = vpack.c.bf16 (!%p191_p9), %v1182_v24, %v1181_v23  ;;  %v316_v28 = vld [vmem:[%s2524_s3 + $0x28] sm:$0xff] (!%p191_p9)  ;;  %v1183_v29 = vld [vmem:[%s2524_s3 + $0x200] sm:$0xff] (!%p191_p9)  ;;  %v317_v32 = vld [vmem:[%s2524_s3 + $0x30] sm:$0xff] (!%p191_p9) }
  0x14   : > { %v1184_v30 = vld [vmem:[%s2524_s3 + $0x208] sm:$0xff] (!%p191_p9)  ;;  %v1632_v31 = vpack.c.bf16 (!%p191_p9), %v316_v28, %v315_v26  ;;  %v318_v34 = vld [vmem:[%s2524_s3 + $0x38] sm:$0xff] (!%p191_p9)  ;;  %v1185_v35 = vld [vmem:[%s2524_s3 + $0x210] sm:$0xff] (!%p191_p9) }
  0x15   : > { %s218_s7 = scalar_select %p217_p10, %s1981_s22, 1  ;;  %1718 = vmatpush3.bf16.msra.mxu1 %v1717_v12  ;;  %v1726_v33 = vpack.c.bf16 %v1184_v30, %v1183_v29  ;;  %v1186_v36 = vld [vmem:[%s2524_s3 + $0x218] sm:$0xff]  ;;  %v1635_v37 = vpack.c.bf16 %v318_v34, %v317_v32  ;;  %v319_v39 = vld [vmem:[%s2524_s3 + $0x40] sm:$0xff]  ;;  %v320_v40 = vld [vmem:[%s2524_s3 + $0x48] sm:$0xff] }
  0x16   : > { %1719 = vmatprep.subr.bf16.mxu1 %v1924_v0  ;;  %v1729_v38 = vpack.c.bf16 %v1186_v36, %v1185_v35  ;;  %v1638_v41 = vpack.c.bf16 %v320_v40, %v319_v39  ;;  %v321_v42 = vld [vmem:[%s2524_s3 + $0x50] sm:$0xff]  ;;  %v322_v43 = vld [vmem:[%s2524_s3 + $0x58] sm:$0xff]  ;;  %v323_v45 = vld [vmem:[%s2524_s3 + $0x60] sm:$0xff] }
  0x17   : > { %s1242_s14 = sshll.u32 %s218_s7, 4  ;;  %v1641_v44 = vpack.c.bf16 %v322_v43, %v321_v42  ;;  %v324_v46 = vld [vmem:[%s2524_s3 + $0x68] sm:$0x1]  ;;  %v1187_v48 = vld [vmem:[%s2524_s3 + $0x220] sm:$0xff]  ;;  %v1127_v52 = vld [vmem:[%s2524_s3 + $0x70] sm:$0xff] }
  0x18   : > { %s221_s25 = scalar_lea.vmem %s2521_s0, %s1242_s14  ;;  %v1644_v47 = vpack.c.bf16 %v324_v46, %v323_v45  ;;  %v1188_v49 = vld [vmem:[%s2524_s3 + $0x228] sm:$0x1]  ;;  %v1128_v53 = vld [vmem:[%s2524_s3 + $0x78] sm:$0xff]  ;;  %v1191_v57 = vld [vmem:[%s2524_s3 + $0x230] sm:$0xff]  ;;  %s215_s14 = sand.u32 1, %s1914_s19  }
  0x19   : > { %v222_v14 = vld [vmem:[%s221_s25] sm:$0xff]  ;;  %v223_v15 = vld [vmem:[%s221_s25 + $0x8] sm:$0x1]  ;;  %1721 = vmatpush3.bf16.msra.mxu1 %v1720_v21  ;;  %v1732_v50 = vpack.c.bf16 %v1188_v49, %v1187_v48  ;;  %v1192_v58 = vld [vmem:[%s2524_s3 + $0x238] sm:$0xff]  ;;  %v1648_v59 = vpack.c.bf16 %v1128_v53, %v1127_v52  ;;  %s216_s23 = scalar_lea.vmem [#allocation2], %s215_s14  ;;  %s1050_s22 = scalar_lea.sflag [#allocation3], %s215_s14 }
  0x1a   : > { %v1622_v17 = vpack.c.bf16 %v223_v15, %v222_v14  ;;  %1722 = vmatprep.subr.bf16.mxu1 %v1924_v0  ;;  %v1129_v61 = vld [vmem:[%s2524_s3 + $0x80] sm:$0xff]  ;;  %v1130_v62 = vld [vmem:[%s2524_s3 + $0x88] sm:$0xff]  ;;  %v1736_v63 = vpack.c.bf16 %v1192_v58, %v1191_v57  ;;  %v1131_v6 = vld [vmem:[%s2524_s3 + $0x90] sm:$0xff]  ;;  %s1062_s25 = sshll.u32 %s216_s23, 4  ;;  %s2481_s25 = int_to_ptr.vmem [resolvable:$true] %s1062_s25 }
  0x1b   : > { %v1193_v3 = vld [vmem:[%s2524_s3 + $0x240] sm:$0xff]  ;;  %v1194_v4 = vld [vmem:[%s2524_s3 + $0x248] sm:$0xff]  ;;  %v1651_v5 = vpack.c.bf16 %v1130_v62, %v1129_v61  ;;  %v1132_v7 = vld [vmem:[%s2524_s3 + $0x98] sm:$0xff]  ;;  %s1860_s7 = scalar_lea.vmem %s2481_s25, 16  ;;  %p1867_p0 = scmp.lt.s32.totalorder %s2481_s25, %s1865_s9 }
  0x1c   : > { %1624 = vmatpush3.bf16.msk.msra.mxu0 %vm2029_vm3, %v1622_v17  ;;  %v1739_v9 = vpack.c.bf16 %v1194_v4, %v1193_v3  ;;  %v1195_v10 = vld [vmem:[%s2524_s3 + $0x250] sm:$0xff]  ;;  %v1196_v11 = vld [vmem:[%s2524_s3 + $0x258] sm:$0xff]  ;;  %v1654_v12 = vpack.c.bf16 %v1132_v7, %v1131_v6  ;;  %v1133_v13 = vld [vmem:[%s2524_s3 + $0xa0] sm:$0xff]  ;;  %p1861_p11 = scmp.ne.s32.totalorder %s2481_s25, %s1860_s7  ;;  %p1868_p1 = scmp.lt.s32.totalorder %s1866_s10, %s1860_s7 }
  0x1d   : > { %1625 = vmatprep.subr.bf16.mxu0 %v1924_v0  ;;  %1724 = vmatpush3.bf16.msra.mxu1 %v1723_v27  ;;  %v1134_v14 = vld [vmem:[%s2524_s3 + $0xa8] sm:$0xff]  ;;  %v1742_v15 = vpack.c.bf16 %v1196_v11, %v1195_v10  ;;  %v1197_v16 = vld [vmem:[%s2524_s3 + $0x260] sm:$0xff]  ;;  %v1136_v20 = vld [vmem:[%s2524_s3 + $0xb8] sm:$0xff] }
  0x1e   : > { %1725 = vmatprep.subr.bf16.mxu1 %v1924_v0  ;;  %v1198_v17 = vld [vmem:[%s2524_s3 + $0x268] sm:$0xff]  ;;  %v1199_v22 = vld [vmem:[%s2524_s3 + $0x270] sm:$0xff]  ;;  %v1200_v23 = vld [vmem:[%s2524_s3 + $0x278] sm:$0xff]  ;;  %p1862_p12 = pnand %p1861_p11, %p1998_p5  ;;  %p1869_p2 = por %p1868_p1, %p1867_p0 }
  0x1f   : > { %1371 = vmatmul.mubr.msk.f32.vlgmr.msra.gmra.mrb[0].mxu0 %vm231_vm4, %v224_v18  ;;  %v1657_v18 = vpack.c.bf16 %v1134_v14, %v1133_v13  ;;  %v1745_v21 = vpack.c.bf16 %v1198_v17, %v1197_v16  ;;  %v1138_v26 = vld [vmem:[%s2524_s3 + $0xc8] sm:$0xff]  ;;  %v1748_v27 = vpack.c.bf16 %v1200_v23, %v1199_v22  ;;  %v1201_v28 = vld [vmem:[%s2524_s3 + $0x280] sm:$0xff]  ;;  %v1140_v32 = vld [vmem:[%s2524_s3 + $0xd8] sm:$0x1] }
  0x20   : > { %1627 = vmatpush3.bf16.msra.mxu0 %v1626_v19  ;;  %1401 = vmatprep.mubr.msk.f32.mxu0 %vm1925_vm1, %v1926_v2  ;;  %v1135_v19 = vld [vmem:[%s2524_s3 + $0xb0] sm:$0xff]  ;;  %v1202_v29 = vld [vmem:[%s2524_s3 + $0x288] sm:$0xff]  ;;  %v1204_v35 = vld [vmem:[%s2524_s3 + $0x298] sm:$0x1]  ;;  %p1863_p13 = pneg %p1862_p12 }
  0x21   : > { %1628 = vmatprep.subr.bf16.mxu0 %v1924_v0  ;;  %1727 = vmatpush3.bf16.msra.mxu1 %v1726_v33  ;;  %v1660_v24 = vpack.c.bf16 %v1136_v20, %v1135_v19  ;;  %v1751_v33 = vpack.c.bf16 %v1202_v29, %v1201_v28  ;;  %v1203_v34 = vld [vmem:[%s2524_s3 + $0x290] sm:$0xff]  ;;  %v1207_v40 = vld [vmem:[%s2524_s3 + $0x2a0] sm:$0xff]  ;;  %v1146_v45 = vld [vmem:[%s2524_s3 + $0xf8] sm:$0xff] }
  0x22   : > { %1728 = vmatprep.subr.bf16.mxu1 %v1924_v0  ;;  %v1754_v39 = vpack.c.bf16 %v1204_v35, %v1203_v34  ;;  %v1209_v48 = vld [vmem:[%s2524_s3 + $0x2b0] sm:$0xff]  ;;  %v1210_v49 = vld [vmem:[%s2524_s3 + $0x2b8] sm:$0xff]  ;;  %v1148_v52 = vld [vmem:[%s2524_s3 + $0x108] sm:$0xff]  ;;  %p1870_p3 = pnand %p1869_p2, %p1863_p13 }
  0x23   : > { %v1761_v53 = vpack.c.bf16 %v1210_v49, %v1209_v48  ;;  %v1149_v57 = vld [vmem:[%s2524_s3 + $0x110] sm:$0xff]  ;;  %v1150_v58 = vld [vmem:[%s2524_s3 + $0x118] sm:$0xff]  ;;  %v1152_v3 = vld [vmem:[%s2524_s3 + $0x128] sm:$0xff] }
  0x24   : > { %1630 = vmatpush3.bf16.msra.mxu0 %v1629_v25  ;;  %v1137_v25 = vld [vmem:[%s2524_s3 + $0xc0] sm:$0xff]  ;;  %v1213_v61 = vld [vmem:[%s2524_s3 + $0x2d0] sm:$0xff]  ;;  %v1214_v62 = vld [vmem:[%s2524_s3 + $0x2d8] sm:$0xff] }
  0x25   : > { %1631 = vmatprep.subr.bf16.mxu0 %v1924_v0  ;;  %1730 = vmatpush3.bf16.msra.mxu1 %v1729_v38  ;;  %v1663_v30 = vpack.c.bf16 %v1138_v26, %v1137_v25  ;;  %v1144_v38 = vld [vmem:[%s2524_s3 + $0xe8] sm:$0xff]  ;;  %v1767_v4 = vpack.c.bf16 %v1214_v62, %v1213_v61  ;;  %v1154_v10 = vld [vmem:[%s2524_s3 + $0x138] sm:$0xff]  ;;  %v1161_v28 = vld [vmem:[%s2524_s3 + $0x160] sm:$0xff] }
  0x26   : > { %1731 = vmatprep.subr.bf16.mxu1 %v1924_v0  ;;  %v1216_v6 = vld [vmem:[%s2524_s3 + $0x2e8] sm:$0xff]  ;;  %v1218_v13 = vld [vmem:[%s2524_s3 + $0x2f8] sm:$0xff]  ;;  %v1163_v35 = vld [vmem:[%s2524_s3 + $0x170] sm:$0xff] }
  0x27   : > { %v1156_v16 = vld [vmem:[%s2524_s3 + $0x148] sm:$0x1]  ;;  %v1160_v22 = vld [vmem:[%s2524_s3 + $0x158] sm:$0xff]  ;;  %v1231_v49 = vld [vmem:[%s2524_s3 + $0x350] sm:$0xff] }
  0x28   : > { %1633 = vmatpush3.bf16.msra.mxu0 %v1632_v31  ;;  %v1139_v31 = vld [vmem:[%s2524_s3 + $0xd0] sm:$0xff]  ;;  %v1220_v19 = vld [vmem:[%s2524_s3 + $0x308] sm:$0x1]  ;;  %v1224_v25 = vld [vmem:[%s2524_s3 + $0x318] sm:$0xff] }
  0x29   : > { %1634 = vmatprep.subr.bf16.mxu0 %v1924_v0  ;;  %1734 = vmatpush3.bf16.msk.msra.mxu1 %vm2029_vm3, %v1732_v50  ;;  %v1666_v36 = vpack.c.bf16 %v1140_v32, %v1139_v31  ;;  %v1162_v29 = vld [vmem:[%s2524_s3 + $0x168] sm:$0xff]  ;;  %v1225_v32 = vld [vmem:[%s2524_s3 + $0x320] sm:$0xff]  ;;  %v1235_v62 = vld [vmem:[%s2524_s3 + $0x370] sm:$0xff] }
  0x2a   : > { %1735 = vmatprep.subr.bf16.mxu1 %v1924_v0  ;;  %v1695_v34 = vpack.c.bf16 %v1162_v29, %v1161_v28 }
  0x2c   : > { %1636 = vmatpush3.bf16.msra.mxu0 %v1635_v37  ;;  %v1143_v37 = vld [vmem:[%s2524_s3 + $0xe0] sm:$0xff] }
  0x2d   : > { %1637 = vmatprep.subr.bf16.mxu0 %v1924_v0  ;;  %v1670_v42 = vpack.c.bf16 %v1144_v38, %v1143_v37  ;;  %v1227_v38 = vld [vmem:[%s2524_s3 + $0x330] sm:$0xff] }
  0x30   : > { %1639 = vmatpush3.bf16.msra.mxu0 %v1638_v41  ;;  %v1208_v41 = vld [vmem:[%s2524_s3 + $0x2a8] sm:$0xff] }
  0x31   : > { %1640 = vmatprep.subr.bf16.mxu0 %v1924_v0  ;;  %v1758_v46 = vpack.c.bf16 %v1208_v41, %v1207_v40  ;;  %v1165_v41 = vld [vmem:[%s2524_s3 + $0x180] sm:$0xff] }
  0x34   : > { %1642 = vmatpush3.bf16.msra.mxu0 %v1641_v44  ;;  %v1145_v44 = vld [vmem:[%s2524_s3 + $0xf0] sm:$0xff] }
  0x35   : > { %1643 = vmatprep.subr.bf16.mxu0 %v1924_v0  ;;  %v1673_v50 = vpack.c.bf16 %v1146_v45, %v1145_v44  ;;  %v1230_v44 = vld [vmem:[%s2524_s3 + $0x348] sm:$0xff] }
  0x38   : > { %1646 = vmatpush3.bf16.msk.msra.mxu0 %vm2029_vm3, %v1644_v47 }
  0x39   : > { %1647 = vmatprep.subr.bf16.mxu0 %v1924_v0 }
  0x8f   : > { %v229_v51 = vpop.permute.xlu0 %228 }
  0xf2   : > { %v305_v54 = vpop.f32.mrb[0].mxu0 }
  0xf3   : > { %v306_v55 = vadd.f32 %v305_v54, %v229_v51  ;;  %v1372_v56 = vpop.f32.mrb[1].mxu0  ;;  %v1147_v51 = vld [vmem:[%s2524_s3 + $0x100] sm:$0xff] }
  0xf4   : > { %v1211_v54 = vld [vmem:[%s2524_s3 + $0x2c0] sm:$0xff]  ;;  %v1676_v56 = vpack.c.bf16 %v1148_v52, %v1147_v51 }
  0xf5   : > { %v2149_v60 = vmax.f32 %v306_v55, 0.0  ;;  %v1212_v55 = vld [vmem:[%s2524_s3 + $0x2c8] sm:$0xff]  ;;  %v1169_v52 = vld [vmem:[%s2524_s3 + $0x1a0] sm:$0xff] }
  0xf7   : > { %1402 = vmatmul.mubr.msk.f32.vlgmr.msra.gmra.mrb[2].mxu0 %vm325_vm5, %v2149_v60  ;;  %v694_v1 = vrot.slane %v2149_v60, 4  ;;  %v418_v43 = vrot.slane %v2149_v60, 1  ;;  %v786_v47 = vrot.slane %v2149_v60, 5  ;;  %v878_v31 = vrot.slane %v2149_v60, 6 }
  0xf8   : > { %1649 = vmatpush3.bf16.msra.mxu0 %v1648_v59  ;;  %1432 = vmatprep.mubr.msk.f32.mxu0 %vm1925_vm1, %v1926_v2  ;;  %v1764_v59 = vpack.c.bf16 %v1212_v55, %v1211_v54  ;;  %v1233_v55 = vld [vmem:[%s2524_s3 + $0x360] sm:$0xff] }
  0xf9   : > { %1526 = vmatmul.mubr.msk.f32.vlgmr.msra.gmra.mrb[0].mxu1 %vm325_vm5, %v694_v1  ;;  %1650 = vmatprep.subr.bf16.mxu0 %v1924_v0  ;;  %v1151_v1 = vld [vmem:[%s2524_s3 + $0x120] sm:$0xff] }
  0xfa   : > { %1737 = vmatpush3.bf16.msra.mxu1 %v1736_v63  ;;  %1556 = vmatprep.mubr.msk.f32.mxu1 %vm1925_vm1, %v1926_v2  ;;  %v1679_v63 = vpack.c.bf16 %v1150_v58, %v1149_v57  ;;  %v1682_v7 = vpack.c.bf16 %v1152_v3, %v1151_v1  ;;  %v1171_v58 = vld [vmem:[%s2524_s3 + $0x1b0] sm:$0xff] }
  0xfb   : > { %1738 = vmatprep.subr.bf16.mxu1 %v1924_v0 }
  0xfc   : > { %1652 = vmatpush3.bf16.msra.mxu0 %v1651_v5  ;;  %v1215_v5 = vld [vmem:[%s2524_s3 + $0x2e0] sm:$0xff] }
  0xfd   : > { %1653 = vmatprep.subr.bf16.mxu0 %v1924_v0  ;;  %v1770_v11 = vpack.c.bf16 %v1216_v6, %v1215_v5  ;;  %v970_v5 = vrot.slane %v2149_v60, 7  ;;  %v310_v6 = vld [vmem:[%s2525_s4] sm:$0x1] }
  0xfe   : > { %1740 = vmatpush3.bf16.msra.mxu1 %v1739_v9  ;;  %v1153_v9 = vld [vmem:[%s2524_s3 + $0x130] sm:$0xff] }
  0xff   : > { %1741 = vmatprep.subr.bf16.mxu1 %v1924_v0  ;;  %v1685_v14 = vpack.c.bf16 %v1154_v10, %v1153_v9 }
 0x100   : > { %1655 = vmatpush3.bf16.msra.mxu0 %v1654_v12  ;;  %v1217_v12 = vld [vmem:[%s2524_s3 + $0x2f0] sm:$0xff] }
 0x101   : > { %1656 = vmatprep.subr.bf16.mxu0 %v1924_v0  ;;  %v1773_v17 = vpack.c.bf16 %v1218_v13, %v1217_v12 }
 0x102   : > { %1743 = vmatpush3.bf16.msra.mxu1 %v1742_v15  ;;  %v1155_v15 = vld [vmem:[%s2524_s3 + $0x140] sm:$0xff] }
 0x103   : > { %1744 = vmatprep.subr.bf16.mxu1 %v1924_v0  ;;  %v1688_v20 = vpack.c.bf16 %v1156_v16, %v1155_v15 }
 0x104   : > { %1658 = vmatpush3.bf16.msra.mxu0 %v1657_v18  ;;  %v1219_v18 = vld [vmem:[%s2524_s3 + $0x300] sm:$0xff] }
 0x105   : > { %1659 = vmatprep.subr.bf16.mxu0 %v1924_v0  ;;  %v1776_v23 = vpack.c.bf16 %v1220_v19, %v1219_v18 }
 0x106   : > { %1746 = vmatpush3.bf16.msra.mxu1 %v1745_v21  ;;  %v1159_v21 = vld [vmem:[%s2524_s3 + $0x150] sm:$0xff] }
 0x107   : > { %1747 = vmatprep.subr.bf16.mxu1 %v1924_v0  ;;  %v1692_v26 = vpack.c.bf16 %v1160_v22, %v1159_v21 }
 0x108   : > { %1661 = vmatpush3.bf16.msra.mxu0 %v1660_v24  ;;  %v1223_v24 = vld [vmem:[%s2524_s3 + $0x310] sm:$0xff] }
 0x109   : > { %1662 = vmatprep.subr.bf16.mxu0 %v1924_v0 }
 0x10a   : > { %1749 = vmatpush3.bf16.msra.mxu1 %v1748_v27  ;;  %v510_v27 = vrot.slane %v2149_v60, 2 }
 0x10b   : > { %1750 = vmatprep.subr.bf16.mxu1 %v1924_v0 }
 0x10c   : > { %1664 = vmatpush3.bf16.msra.mxu0 %v1663_v30  ;;  %v1780_v30 = vpack.c.bf16 %v1224_v25, %v1223_v24 }
 0x10d   : > { %1665 = vmatprep.subr.bf16.mxu0 %v1924_v0 }
 0x10e   : > { %1752 = vmatpush3.bf16.msra.mxu1 %v1751_v33  ;;  %v1226_v33 = vld [vmem:[%s2524_s3 + $0x328] sm:$0xff] }
 0x10f   : > { %1753 = vmatprep.subr.bf16.mxu1 %v1924_v0  ;;  %v1783_v37 = vpack.c.bf16 %v1226_v33, %v1225_v32 }
 0x110   : > { %1668 = vmatpush3.bf16.msk.msra.mxu0 %vm2029_vm3, %v1666_v36  ;;  %v1164_v36 = vld [vmem:[%s2524_s3 + $0x178] sm:$0xff] }
 0x111   : > { %1669 = vmatprep.subr.bf16.mxu0 %v1924_v0  ;;  %v1698_v40 = vpack.c.bf16 %v1164_v36, %v1163_v35 }
 0x112   : > { %1756 = vmatpush3.bf16.msk.msra.mxu1 %vm2029_vm3, %v1754_v39  ;;  %v1228_v39 = vld [vmem:[%s2524_s3 + $0x338] sm:$0xff] }
 0x113   : > { %1433 = vmatmul.mubr.msk.f32.vlgmr.msra.gmra.mrb[2].mxu0 %vm325_vm5, %v418_v43  ;;  %1757 = vmatprep.subr.bf16.mxu1 %v1924_v0  ;;  %v1229_v43 = vld [vmem:[%s2524_s3 + $0x340] sm:$0xff] }
 0x114   : > { %1671 = vmatpush3.bf16.msra.mxu0 %v1670_v42  ;;  %1463 = vmatprep.mubr.msk.f32.mxu0 %vm1925_vm1, %v1926_v2  ;;  %v1786_v42 = vpack.c.bf16 %v1228_v39, %v1227_v38  ;;  %v1789_v48 = vpack.c.bf16 %v1230_v44, %v1229_v43 }
 0x115   : > { %1557 = vmatmul.mubr.msk.f32.vlgmr.msra.gmra.mrb[0].mxu1 %vm325_vm5, %v786_v47  ;;  %1672 = vmatprep.subr.bf16.mxu0 %v1924_v0  ;;  %v1168_v47 = vld [vmem:[%s2524_s3 + $0x198] sm:$0xff] }
 0x116   : > { %1759 = vmatpush3.bf16.msra.mxu1 %v1758_v46  ;;  %1587 = vmatprep.mubr.msk.f32.mxu1 %vm1925_vm1, %v1926_v2  ;;  %v1167_v46 = vld [vmem:[%s2524_s3 + $0x190] sm:$0xff] }
 0x117   : > { %1760 = vmatprep.subr.bf16.mxu1 %v1924_v0  ;;  %v1704_v51 = vpack.c.bf16 %v1168_v47, %v1167_v46 }
 0x118   : > { %1674 = vmatpush3.bf16.msra.mxu0 %v1673_v50  ;;  %v1232_v50 = vld [vmem:[%s2524_s3 + $0x358] sm:$0xff] }
 0x119   : > { %1675 = vmatprep.subr.bf16.mxu0 %v1924_v0  ;;  %v1792_v54 = vpack.c.bf16 %v1232_v50, %v1231_v49 }
 0x11a   : > { %1762 = vmatpush3.bf16.msra.mxu1 %v1761_v53  ;;  %v1170_v53 = vld [vmem:[%s2524_s3 + $0x1a8] sm:$0xff] }
 0x11b   : > { %1763 = vmatprep.subr.bf16.mxu1 %v1924_v0  ;;  %v1707_v57 = vpack.c.bf16 %v1170_v53, %v1169_v52 }
 0x11c   : > { %1677 = vmatpush3.bf16.msra.mxu0 %v1676_v56  ;;  %v1234_v56 = vld [vmem:[%s2524_s3 + $0x368] sm:$0xff] }
 0x11d   : > { %1678 = vmatprep.subr.bf16.mxu0 %v1924_v0  ;;  %v1795_v61 = vpack.c.bf16 %v1234_v56, %v1233_v55 }
 0x11e   : > { %1765 = vmatpush3.bf16.msra.mxu1 %v1764_v59  ;;  %v1172_v59 = vld [vmem:[%s2524_s3 + $0x1b8] sm:$0x1] }
 0x11f   : > { %1766 = vmatprep.subr.bf16.mxu1 %v1924_v0  ;;  %v1710_v1 = vpack.c.bf16 %v1172_v59, %v1171_v58 }
 0x120   : > { %1680 = vmatpush3.bf16.msra.mxu0 %v1679_v63  ;;  %v1236_v63 = vld [vmem:[%s2524_s3 + $0x378] sm:$0x1] }
 0x121   : > { %1681 = vmatprep.subr.bf16.mxu0 %v1924_v0  ;;  %v1798_v3 = vpack.c.bf16 %v1236_v63, %v1235_v62 }
 0x122   : > { %1768 = vmatpush3.bf16.msra.mxu1 %v1767_v4  ;;  %v602_v4 = vrot.slane %v2149_v60, 3 }
 0x123   : > { %1769 = vmatprep.subr.bf16.mxu1 %v1924_v0 }
 0x124   : > { %1683 = vmatpush3.bf16.msra.mxu0 %v1682_v7 }
 0x125   : > { %1684 = vmatprep.subr.bf16.mxu0 %v1924_v0 }
 0x126   : > { %1771 = vmatpush3.bf16.msra.mxu1 %v1770_v11 }
 0x127   : > { %1772 = vmatprep.subr.bf16.mxu1 %v1924_v0 }
 0x128   : > { %1686 = vmatpush3.bf16.msra.mxu0 %v1685_v14 }
 0x129   : > { %1687 = vmatprep.subr.bf16.mxu0 %v1924_v0 }
 0x12a   : > { %1774 = vmatpush3.bf16.msra.mxu1 %v1773_v17 }
 0x12b   : > { %1775 = vmatprep.subr.bf16.mxu1 %v1924_v0 }
 0x12c   : > { %1690 = vmatpush3.bf16.msk.msra.mxu0 %vm2029_vm3, %v1688_v20 }
 0x12d   : > { %1691 = vmatprep.subr.bf16.mxu0 %v1924_v0 }
 0x12e   : > { %1778 = vmatpush3.bf16.msk.msra.mxu1 %vm2029_vm3, %v1776_v23 }
 0x12f   : > { %1464 = vmatmul.mubr.msk.f32.vlgmr.msra.gmra.mrb[2].mxu0 %vm325_vm5, %v510_v27  ;;  %1779 = vmatprep.subr.bf16.mxu1 %v1924_v0 }
 0x130   : > { %1693 = vmatpush3.bf16.msra.mxu0 %v1692_v26  ;;  %1494 = vmatprep.mubr.msk.f32.mxu0 %vm1925_vm1, %v1926_v2 }
 0x131   : > { %1588 = vmatmul.mubr.msk.f32.vlgmr.msra.gmra.mrb[0].mxu1 %vm325_vm5, %v878_v31  ;;  %1694 = vmatprep.subr.bf16.mxu0 %v1924_v0 }
 0x132   : > { %1781 = vmatpush3.bf16.msra.mxu1 %v1780_v30  ;;  %1618 = vmatprep.mubr.msk.f32.mxu1 %vm1925_vm1, %v1926_v2  ;;  %v1166_v2 = vld [vmem:[%s2524_s3 + $0x188] sm:$0xff] }
 0x133   : > { %1782 = vmatprep.subr.bf16.mxu1 %v1924_v0  ;;  %v1701_v45 = vpack.c.bf16 %v1166_v2, %v1165_v41 }
 0x134   : > { %1696 = vmatpush3.bf16.msra.mxu0 %v1695_v34 }
 0x135   : > { %1697 = vmatprep.subr.bf16.mxu0 %v1924_v0 }
 0x136   : > { %1784 = vmatpush3.bf16.msra.mxu1 %v1783_v37 }
 0x137   : > { %1785 = vmatprep.subr.bf16.mxu1 %v1924_v0 }
 0x138   : > { %1699 = vmatpush3.bf16.msra.mxu0 %v1698_v40 }
 0x139   : > { %1700 = vmatprep.subr.bf16.mxu0 %v1924_v0 }
 0x13a   : > { %1787 = vmatpush3.bf16.msra.mxu1 %v1786_v42 }
 0x13b   : > { %1788 = vmatprep.subr.bf16.mxu1 %v1924_v0 }
 0x13c   : > { %1702 = vmatpush3.bf16.msra.mxu0 %v1701_v45 }
 0x13d   : > { %1703 = vmatprep.subr.bf16.mxu0 %v1924_v0 }
 0x13e   : > { %1790 = vmatpush3.bf16.msra.mxu1 %v1789_v48 }
 0x13f   : > { %1791 = vmatprep.subr.bf16.mxu1 %v1924_v0 }
 0x140   : > { %1705 = vmatpush3.bf16.msra.mxu0 %v1704_v51 }
 0x141   : > { %1706 = vmatprep.subr.bf16.mxu0 %v1924_v0 }
 0x142   : > { %1793 = vmatpush3.bf16.msra.mxu1 %v1792_v54 }
 0x143   : > { %1794 = vmatprep.subr.bf16.mxu1 %v1924_v0 }
 0x144   : > { %1708 = vmatpush3.bf16.msra.mxu0 %v1707_v57 }
 0x145   : > { %1709 = vmatprep.subr.bf16.mxu0 %v1924_v0 }
 0x146   : > { %1796 = vmatpush3.bf16.msra.mxu1 %v1795_v61 }
 0x147   : > { %1797 = vmatprep.subr.bf16.mxu1 %v1924_v0 }
 0x148   : > { %1712 = vmatpush3.bf16.msk.msra.mxu0 %vm2029_vm3, %v1710_v1 }
 0x14a   : > { %1800 = vmatpush3.bf16.msk.msra.mxu1 %vm2029_vm3, %v1798_v3 }
 0x14b   : > { %1495 = vmatmul.mubr.msk.f32.vlgmr.msra.gmra.mrb[2].mxu0 %vm325_vm5, %v602_v4 }
 0x14d   : > { %1619 = vmatmul.mubr.msk.f32.vlgmr.msra.gmra.mrb[0].mxu1 %vm325_vm5, %v970_v5 }
 0x21e   : > { %v674_v0 = vpop.f32.mrb[2].mxu0 }
 0x21f   : > { %v1801_v7 = vadd.f32 %v674_v0, %v310_v6  ;;  %v1496_v9 = vpop.f32.mrb[3].mxu0 }
 0x220   : > { %v1042_v8 = vpop.f32.mrb[0].mxu1 }
 0x221   : > { %v1802_v10 = vadd.f32 %v1801_v7, %v1042_v8  ;;  %v1620_v11 = vpop.f32.mrb[1].mxu1 }
 0x223   : > { %1048 = vst.msk [vmem:[%s216_s23] sm:$0x1] %vm1047_vm6, %v1802_v10 }
 0x224   : > { %1873 = shalt.err (!%p1870_p3)
}
 0x225   : > { %s1874_s11 = scalar_lea.hbm %s2479_s6, 16  ;;  %s1878_s14 = scalar_lea.hbm %s2526_s5, 32 }
 0x226   : > { %p1875_p4 = scmp.ne.s32.totalorder %s2479_s6, %s1874_s11  ;;  %p1879_p9 = scmp.lt.u32.totalorder %s2479_s6, %s2526_s5 }
 0x227   : > { %p1880_p10 = scmp.lt.u32.totalorder %s1878_s14, %s1874_s11  ;;  %p1882_p12 = scmp.lt.u32.totalorder %s1874_s11, %s2479_s6 }
 0x228   : > { %p1876_p7 = pnand %p1875_p4, %p1998_p5 }
 0x229   : > { %p1881_p11 = por %p1880_p10, %p1879_p9 }
 0x22a   : > { %p1877_p8 = pneg %p1876_p7 }
 0x22b   : > { %p1883_p13 = por %p1882_p12, %p1881_p11 }
 0x22d   : > { %p1884_p0 = pnand %p1883_p13, %p1877_p8 }
 0x22f   : > { %1887 = shalt.err (!%p1884_p0)
}
 0x230   : > { %1815 = dma.vmem_to_hbm [thread:$0]  (%p1998_p5), %s2481_s25, 16, %s2479_s6, %s1050_s22  }
 0x231 PF: > { %p1821_p1 = scmp.ge.s32.totalorder %s1922_s21, 2  ;;  %s1074_s17 = sand.u32 1, %s1910_s18  }
 0x232   : > { %s1075_s23 = scalar_lea.sflag [#allocation3], %s1074_s17 }
 0x233   : > { %p1818_p2 = pnand %p1821_p1, %p2002_p6 }
 0x235   : > { %1905 = dma.done.wait (!%p1818_p2), %s1075_s23, 16  }
 0x236   : > { %1907 = vsyncadd (!%p1818_p2), %s1075_s23, 4294967280  ;;  %p15_p3 = scmp.ge.s32.totalorder %s1985_s24, 4   ;;  %s2531_s18 = smov %s1914_s19 }
 0x237   : > { %s2532_s19 = smov %s1918_s20  ;;  %s2533_s20 = smov %s1996_s27 }
 0x238   : > { %s2534_s21 = smov %s1985_s24  ;;  %17 = sbr.rel (!%p15_p3) target bundleno = 3 (0x3), region = 82 }
 0x23f   :  { %1079 = vsyncpa [#allocation3], 1 }
 0x240   :  { %1081 = vsyncpa [#allocation3 + $0x1], 1 }

</bundles_post_ra>
